<compile_context>
chip_gen: v7x
topology: tpu7x:2x2x1
jax: 0.10.0
libtpu: 0.0.40
codegen_flags: <defaults>
</compile_context>

<pallas_src>
import jax
import jax.numpy as jnp
from jax.experimental import pallas as pl
from jax.experimental.pallas import tpu as pltpu

_EPS = 1e-5      # nn.BatchNorm3d default
LANE = 128


def _cdiv(a, b):
    return -(-a // b)


def _vmem_limit_bytes():
    """3/4 of physical VMEM (48 MiB on v7x, 96 MiB on v5e/v6e), safe fallback."""
    cap = 64 * 1024 * 1024
    try:
        info_cap = int(pltpu.get_tpu_info().vmem_capacity_bytes)
        if info_cap > 0:
            cap = info_cap
    except Exception:
        pass
    return int(min(cap * 3 // 4, 96 * 1024 * 1024))


# ----------------------------------------------------------------------------
# Single-pass path: whole (B, 2C, S) tensor resident in VMEM.
# Exact PyTorch math: mean first, then mean((x - mean)^2) -> no cancellation.
# ----------------------------------------------------------------------------
def _make_fused_kernel(eps):
    def kernel(x_ref, o_ref):
        x = x_ref[...].astype(jnp.float32)                 # (B, CC, S)
        b, _, s = x.shape
        inv_n = 1.0 / float(b * s)
        mean = jnp.sum(x, axis=(0, 2), keepdims=True) * inv_n
        xc = x - mean
        var = jnp.sum(xc * xc, axis=(0, 2), keepdims=True) * inv_n
        o_ref[...] = (xc * jax.lax.rsqrt(var + eps)).astype(o_ref.dtype)
    return kernel


# ----------------------------------------------------------------------------
# Tiled path, pass 1: per-(component*channel) sum / sum-of-squares.
# Lane-dense accumulator: only VPU adds per step, one final reduce in glue.
# ----------------------------------------------------------------------------
def _make_stats_kernel(S, tS, acc_w, n_s_steps, ragged):
    nchunks = max(1, tS // acc_w)          # acc_w divides tS by construction

    def kernel(x_ref, out_ref):
        i = pl.program_id(2)

        @pl.when(i == 0)
        def _():
            out_ref[...] = jnp.zeros_like(out_ref)

        x = x_ref[...].astype(jnp.float32)                 # (B, tCC, tS)
        if ragged:
            # Mask lanes past the end of S (partial last block, and the fully
            # out-of-range clamped block of the odd megacore split).
            c = pl.program_id(1)
            start = (c * n_s_steps + i) * tS
            lane = jax.lax.broadcasted_iota(jnp.int32, (1, 1, tS), 2)
            x = jnp.where(lane < (S - start), x, 0.0)

        tcc = x.shape[1]
        s = jnp.zeros((tcc, acc_w), jnp.float32)
        ss = jnp.zeros((tcc, acc_w), jnp.float32)
        for j in range(nchunks):                           # lane-aligned slices
            blk = x[:, :, j * acc_w:(j + 1) * acc_w]       # (B, tCC, acc_w)
            s = s + jnp.sum(blk, axis=0)
            ss = ss + jnp.sum(blk * blk, axis=0)
        out_ref[0:1, 0:1, :, :] += s[None, None]
        out_ref[0:1, 1:2, :, :] += ss[None, None]

    return kernel


# ----------------------------------------------------------------------------
# Tiled path, pass 2: y = x * scale + shift (elementwise, edge blocks safe).
# ----------------------------------------------------------------------------
def _normalize_kernel(x_ref, ss_ref, o_ref):
    x = x_ref[...].astype(jnp.float32)                     # (B, tCC, tS)
    scale = ss_ref[0:1, :, 0:1]                            # (1, tCC, 1)
    shift = ss_ref[1:2, :, 0:1]
    o_ref[...] = (x * scale + shift).astype(o_ref.dtype)


# ----------------------------------------------------------------------------
# Tile selection helpers.
# ----------------------------------------------------------------------------
def _largest_cc_tile(CC, max_cc):
    """Largest multiple-of-8 divisor of CC that is <= max_cc (the sublane dim
    of a BlockSpec must be a multiple of 8 or the full extent)."""
    t = (min(max_cc, CC) // 8) * 8
    while t >= 8:
        if CC % t == 0:
            return t
        t -= 8
    # TODO(synk): no suitable divisor (e.g. CC = 2 * large_prime with a huge
    # B*CC row): fall back to the full channel extent and rely on the VMEM
    # limit; a sublane-masked ragged-CC path would be needed to do better.
    return CC


def _choose_s_tile(S, row_bytes, target_bytes):
    """Multiple of 128 (or full S).  Aims for >= 4 S-blocks when S allows, so
    v7x's two cores each get >= 2 blocks and can double-buffer."""
    cap_bytes = max(LANE, (target_bytes // max(row_bytes, 1)) // LANE * LANE)
    cap_split = max(LANE, _cdiv(_cdiv(S, 4), LANE) * LANE)
    tS = min(cap_bytes, cap_split)
    if tS >= S:
        return S
    return tS


def _choose_acc_w(tS):
    """Lane-dense accumulator width: a multiple of 128 dividing tS, keeping the
    per-step unrolled chunk fold to <= 16 slice-adds."""
    if tS % LANE != 0:
        return tS                          # full-extent (small / ragged) lane dim
    n = tS // LANE
    chunks = min(n, 16)
    while n % chunks:
        chunks -= 1
    return (n // chunks) * LANE


# ----------------------------------------------------------------------------
# Public entry point.
# ----------------------------------------------------------------------------
def complex_bn3d(x, *, eps=_EPS, donate_input=False,
                 target_block_bytes=4 * 1024 * 1024,
                 single_pass_max_bytes=None):
    """ComplexBN3D forward.  x: (B, 2, C, D, H, W) -> same shape.

    donate_input=True aliases the input buffer to the output (saves an HBM
    allocation + write stream) -- only use it if x is dead after this call,
    otherwise XLA inserts a hidden defensive copy that makes it slower.
    """
    assert x.ndim == 6 and x.shape[1] == 2, "expect (B, 2, C, D, H, W)"
    B, _, C, D, H, W = x.shape
    CC = 2 * C                      # real & imag channels, independent stats
    S = D * H * W
    x3 = x.reshape(B, CC, S)        # contiguous reshape, no data movement
    itemsize = jnp.dtype(x.dtype).itemsize

    vmem_limit = _vmem_limit_bytes()
    alias = {"input_output_aliases": {0: 0}} if donate_input else {}

    if single_pass_max_bytes is None:
        single_pass_max_bytes = vmem_limit // 8   # headroom for f32 temps + i/o bufs
    total_bytes = B * CC * S * itemsize

    # ---------------- single-pass, VMEM-resident path -----------------------
    if total_bytes <= single_pass_max_bytes:
        full_spec = pl.BlockSpec((B, CC, S), lambda i: (0, 0, 0))
        y3 = pl.pallas_call(
            _make_fused_kernel(eps),
            out_shape=jax.ShapeDtypeStruct((B, CC, S), x.dtype),
            grid_spec=pltpu.PrefetchScalarGridSpec(
                num_scalar_prefetch=0, grid=(1,),
                in_specs=[full_spec], out_specs=full_spec),
            compiler_params=pltpu.CompilerParams(
                dimension_semantics=("arbitrary",),
                vmem_limit_bytes=vmem_limit),
            **alias,
        )(x3)
        return y3.reshape(B, 2, C, D, H, W)

    # ---------------- tiled two-pass path ------------------------------------
    target = max(LANE * 8 * itemsize, min(target_block_bytes, vmem_limit // 8))

    # Channel (sublane) tiling only when a minimal (B, CC, 128) block is too big.
    if B * CC * LANE * itemsize > target:
        tCC = _largest_cc_tile(CC, max(1, target // (B * LANE * itemsize)))
    else:
        tCC = CC
    nCC = CC // tCC

    tS = _choose_s_tile(S, B * tCC * itemsize, target)
    acc_w = _choose_acc_w(tS)
    nS = _cdiv(S, tS)
    ncore = 2 if nS >= 2 else 1               # megacore split of the stats sweep
    n_s_steps = _cdiv(nS, ncore)
    ragged = (S % tS != 0) or (ncore * n_s_steps != nS)

    # Pass 1: lane-dense per-(component, channel) sum / sum-of-squares.
    x_stats_spec = pl.BlockSpec(
        (B, tCC, tS),
        lambda cc, c, i: (0, cc, jnp.minimum(c * n_s_steps + i, nS - 1)))
    stats_spec = pl.BlockSpec((1, 2, tCC, acc_w), lambda cc, c, i: (c, 0, cc, 0))
    stats = pl.pallas_call(
        _make_stats_kernel(S, tS, acc_w, n_s_steps, ragged),
        out_shape=jax.ShapeDtypeStruct((ncore, 2, CC, acc_w), jnp.float32),
        grid_spec=pltpu.PrefetchScalarGridSpec(
            num_scalar_prefetch=0,
            grid=(nCC, ncore, n_s_steps),
            in_specs=[x_stats_spec],
            out_specs=stats_spec),
        compiler_params=pltpu.CompilerParams(
            dimension_semantics=("parallel", "parallel", "arbitrary"),
            vmem_limit_bytes=vmem_limit),
    )(x3)

    # Tiny per-channel glue (2*CC values): combine core partials + lane fold.
    # TODO(synk): for inputs with |mean| >> std at huge counts, switch the
    # tiled stats to pivot-shifted sums (Welford-style) to avoid E[x^2]-E[x]^2
    # cancellation; the single-pass path already uses exact (x-mean)^2.
    sums = jnp.sum(stats, axis=(0, 3))                     # (2, CC)
    count = float(B * S)
    mean = sums[0] / count
    var = jnp.maximum(sums[1] / count - mean * mean, 0.0)  # biased var (PyTorch BN)
    inv = jax.lax.rsqrt(var + eps)
    scale_shift = jnp.broadcast_to(
        jnp.stack((inv, -mean * inv))[:, :, None], (2, CC, LANE)
    ).astype(jnp.float32)                                  # lane-dense block

    # Pass 2: lane-dense normalize, fully parallel grid.
    x_norm_spec = pl.BlockSpec((B, tCC, tS), lambda cc, i: (0, cc, i))
    ss_spec = pl.BlockSpec((2, tCC, LANE), lambda cc, i: (0, cc, 0))
    y3 = pl.pallas_call(
        _normalize_kernel,
        out_shape=jax.ShapeDtypeStruct((B, CC, S), x.dtype),
        grid_spec=pltpu.PrefetchScalarGridSpec(
            num_scalar_prefetch=0,
            grid=(nCC, nS),
            in_specs=[x_norm_spec, ss_spec],
            out_specs=x_norm_spec),
        compiler_params=pltpu.CompilerParams(
            dimension_semantics=("parallel", "parallel"),
            vmem_limit_bytes=vmem_limit),
        **alias,
    )(x3, scale_shift)

    return y3.reshape(B, 2, C, D, H, W)


if __name__ == "__main__":
    def ref_bn(v):
        mean = jnp.mean(v, axis=(0, 3, 4, 5), keepdims=True)
        var = jnp.mean((v - mean) ** 2, axis=(0, 3, 4, 5), keepdims=True)
        return (v - mean) / jnp.sqrt(var + _EPS)

    key = jax.random.PRNGKey(0)
    B, C, D, H, W = 2, 4, 8, 16, 16                        # x: (B, 2, C, D, H, W)
    x = jax.random.normal(key, (B, 2, C, D, H, W), dtype=jnp.float32)
    ref = ref_bn(x)

    # 1) Default dispatch: tensor fits in VMEM -> fused single-pass kernel.
    out = jax.block_until_ready(jax.jit(complex_bn3d)(x))
    assert out.shape == x.shape
    err = float(jnp.max(jnp.abs(out - ref)))
    assert err < 1e-4, f"single-pass max abs err {err}"

    # 2) Force the tiled two-pass path (stats + normalize) on the same input.
    tiled = jax.jit(lambda v: complex_bn3d(
        v, single_pass_max_bytes=0, target_block_bytes=64 * 1024))
    out2 = jax.block_until_ready(tiled(x))
    err2 = float(jnp.max(jnp.abs(out2 - ref)))
    assert err2 < 1e-4, f"tiled-path max abs err {err2}"

    # 3) Ragged spatial size (7x7x7 -> S = 343, not a multiple of 128):
    #    exercises the masked edge / overhang blocks of the tiled path.
    x_odd = jax.random.normal(jax.random.PRNGKey(1), (2, 2, 4, 7, 7, 7),
                              dtype=jnp.float32)
    out3 = jax.block_until_ready(tiled(x_odd))
    err3 = float(jnp.max(jnp.abs(out3 - ref_bn(x_odd))))
    assert err3 < 1e-4, f"ragged tiled-path max abs err {err3}"

    print("KERNEL_OK")
</pallas_src>

<mosaic_0001>
module attributes {stable_mosaic.version = 11 : i64} {
  func.func @kernel(%arg0: i32, %arg1: memref<2x8x2048xf32, #tpu.memory_space<vmem>>, %arg2: memref<2x8x2048xf32, #tpu.memory_space<vmem>>) attributes {dimension_semantics = [#tpu.dimension_semantics<arbitrary>], iteration_bounds = array<i64: 1>, scalar_prefetch = 0 : i64, scratch_operands = 0 : i64, tpu.core_type = #tpu.core_type<tc>, window_params = [{pipeline_mode = #tpu.pipeline_mode<synchronous>, transform_indices = @transform_0, window_bounds = array<i64: 2, 8, 2048>}, {pipeline_mode = #tpu.pipeline_mode<synchronous>, transform_indices = @transform_1, window_bounds = array<i64: 2, 8, 2048>}]} {
    %c0 = arith.constant 0 : index
    %c0_0 = arith.constant 0 : index
    %c0_1 = arith.constant 0 : index
    %0 = vector.load %arg1[%c0, %c0_0, %c0_1] : memref<2x8x2048xf32, #tpu.memory_space<vmem>>, vector<2x8x2048xf32>
    %cst = arith.constant dense<0.000000e+00> : vector<8xf32>
    %1 = vector.multi_reduction <add>, %0, %cst [0, 2] : vector<2x8x2048xf32> to vector<8xf32>
    %2 = vector.shape_cast %1 : vector<8xf32> to vector<1x8x1xf32>
    %cst_2 = arith.constant 2.44140625E-4 : f32
    %3 = vector.broadcast %cst_2 : f32 to vector<1x8x1xf32>
    %4 = arith.mulf %2, %3 : vector<1x8x1xf32>
    %5 = vector.broadcast %4 : vector<1x8x1xf32> to vector<2x8x2048xf32>
    %6 = arith.subf %0, %5 : vector<2x8x2048xf32>
    %7 = arith.mulf %6, %6 : vector<2x8x2048xf32>
    %cst_3 = arith.constant dense<0.000000e+00> : vector<8xf32>
    %8 = vector.multi_reduction <add>, %7, %cst_3 [0, 2] : vector<2x8x2048xf32> to vector<8xf32>
    %9 = vector.shape_cast %8 : vector<8xf32> to vector<1x8x1xf32>
    %cst_4 = arith.constant 2.44140625E-4 : f32
    %10 = vector.broadcast %cst_4 : f32 to vector<1x8x1xf32>
    %11 = arith.mulf %9, %10 : vector<1x8x1xf32>
    %cst_5 = arith.constant 9.99999974E-6 : f32
    %12 = vector.broadcast %cst_5 : f32 to vector<1x8x1xf32>
    %13 = arith.addf %11, %12 : vector<1x8x1xf32>
    %14 = math.rsqrt %13 : vector<1x8x1xf32>
    %15 = vector.broadcast %14 : vector<1x8x1xf32> to vector<2x8x2048xf32>
    %16 = arith.mulf %6, %15 : vector<2x8x2048xf32>
    %c0_6 = arith.constant 0 : index
    %c0_7 = arith.constant 0 : index
    %c0_8 = arith.constant 0 : index
    %17 = vector.load %arg2[%c0_6, %c0_7, %c0_8] : memref<2x8x2048xf32, #tpu.memory_space<vmem>>, vector<2x8x2048xf32>
    tpu.vector_store %arg2[%c0_6, %c0_7, %c0_8], %16 {strides = array<i32>} : memref<2x8x2048xf32, #tpu.memory_space<vmem>>, vector<2x8x2048xf32>,
    return
  }
  func.func @transform_0(%arg0: i32) -> (i32, i32, i32) {
    %c0_i32 = arith.constant 0 : i32
    %c0_i32_0 = arith.constant 0 : i32
    %c0_i32_1 = arith.constant 0 : i32
    %c0_i32_2 = arith.constant 0 : i32
    return %c0_i32, %c0_i32_0, %c0_i32_1 : i32, i32, i32
  }
  func.func @transform_1(%arg0: i32) -> (i32, i32, i32) {
    %c0_i32 = arith.constant 0 : i32
    %c0_i32_0 = arith.constant 0 : i32
    %c0_i32_1 = arith.constant 0 : i32
    %c0_i32_2 = arith.constant 0 : i32
    return %c0_i32, %c0_i32_0, %c0_i32_1 : i32, i32, i32
  }
}

</mosaic_0001>

<bundles_post_ra>
// kernel: complex_bn3d.1
= control target key start
LH: loop header
LB: loop body
LE: loop exit
PB: predicated region body
PF: predicated region fallthrough
CT: control target
= control target key end

     0   :  { %s768_s0 = inlined_call_operand.vmem [shape: f32[2,8,2048], index: 0, kind: input, shape index: {}]   ;;  %s769_s1 = inlined_call_operand.vmem [shape: f32[2,8,2048], index: 1, kind: output, shape index: {}]  }
   0x1   :  { %v257_v0 = vld [vmem:[%s768_s0] sm:$0xff]  ;;  %v262_v1 = vld [vmem:[%s768_s0 + $0x8] sm:$0xff]  ;;  %v267_v2 = vld [vmem:[%s768_s0 + $0x10] sm:$0xff] }
   0x2   :  { %v40_v3 = vadd.f32 %v262_v1, %v257_v0  ;;  %v274_v4 = vld [vmem:[%s768_s0 + $0x18] sm:$0xff]  ;;  %v280_v6 = vld [vmem:[%s768_s0 + $0x20] sm:$0xff]  ;;  %v286_v8 = vld [vmem:[%s768_s0 + $0x28] sm:$0xff] }
   0x3   :  { %v292_v10 = vld [vmem:[%s768_s0 + $0x30] sm:$0xff]  ;;  %v298_v12 = vld [vmem:[%s768_s0 + $0x38] sm:$0xff]  ;;  %v304_v14 = vld [vmem:[%s768_s0 + $0x40] sm:$0xff] }
   0x4   :  { %v41_v5 = vadd.f32 %v40_v3, %v267_v2  ;;  %v310_v16 = vld [vmem:[%s768_s0 + $0x48] sm:$0xff]  ;;  %v316_v18 = vld [vmem:[%s768_s0 + $0x50] sm:$0xff]  ;;  %v322_v20 = vld [vmem:[%s768_s0 + $0x58] sm:$0xff] }
   0x5   :  { %v328_v22 = vld [vmem:[%s768_s0 + $0x60] sm:$0xff]  ;;  %v334_v24 = vld [vmem:[%s768_s0 + $0x68] sm:$0xff]  ;;  %v340_v26 = vld [vmem:[%s768_s0 + $0x70] sm:$0xff] }
   0x6   :  { %v42_v7 = vadd.f32 %v41_v5, %v274_v4  ;;  %v346_v28 = vld [vmem:[%s768_s0 + $0x78] sm:$0xff]  ;;  %v352_v30 = vld [vmem:[%s768_s0 + $0x80] sm:$0xff]  ;;  %v358_v32 = vld [vmem:[%s768_s0 + $0x88] sm:$0xff] }
   0x7   :  { %v364_v34 = vld [vmem:[%s768_s0 + $0x90] sm:$0xff]  ;;  %v370_v36 = vld [vmem:[%s768_s0 + $0x98] sm:$0xff]  ;;  %v376_v38 = vld [vmem:[%s768_s0 + $0xa0] sm:$0xff] }
   0x8   :  { %v43_v9 = vadd.f32 %v42_v7, %v280_v6  ;;  %v382_v40 = vld [vmem:[%s768_s0 + $0xa8] sm:$0xff]  ;;  %v388_v42 = vld [vmem:[%s768_s0 + $0xb0] sm:$0xff]  ;;  %v394_v44 = vld [vmem:[%s768_s0 + $0xb8] sm:$0xff] }
   0x9   :  { %v400_v46 = vld [vmem:[%s768_s0 + $0xc0] sm:$0xff]  ;;  %v406_v48 = vld [vmem:[%s768_s0 + $0xc8] sm:$0xff]  ;;  %v412_v50 = vld [vmem:[%s768_s0 + $0xd0] sm:$0xff] }
   0xa   :  { %v44_v11 = vadd.f32 %v43_v9, %v286_v8  ;;  %v418_v52 = vld [vmem:[%s768_s0 + $0xd8] sm:$0xff]  ;;  %v424_v54 = vld [vmem:[%s768_s0 + $0xe0] sm:$0xff]  ;;  %v430_v56 = vld [vmem:[%s768_s0 + $0xe8] sm:$0xff] }
   0xb   :  { %v436_v58 = vld [vmem:[%s768_s0 + $0xf0] sm:$0xff]  ;;  %v442_v60 = vld [vmem:[%s768_s0 + $0xf8] sm:$0xff] }
   0xc   :  { %v45_v13 = vadd.f32 %v44_v11, %v292_v10 }
   0xe   :  { %v46_v15 = vadd.f32 %v45_v13, %v298_v12 }
  0x10   :  { %v47_v17 = vadd.f32 %v46_v15, %v304_v14 }
  0x12   :  { %v48_v19 = vadd.f32 %v47_v17, %v310_v16 }
  0x14   :  { %v49_v21 = vadd.f32 %v48_v19, %v316_v18 }
  0x16   :  { %v50_v23 = vadd.f32 %v49_v21, %v322_v20 }
  0x18   :  { %v51_v25 = vadd.f32 %v50_v23, %v328_v22 }
  0x1a   :  { %v52_v27 = vadd.f32 %v51_v25, %v334_v24 }
  0x1c   :  { %v53_v29 = vadd.f32 %v52_v27, %v340_v26 }
  0x1e   :  { %v54_v31 = vadd.f32 %v53_v29, %v346_v28 }
  0x20   :  { %v55_v33 = vadd.f32 %v54_v31, %v352_v30 }
  0x22   :  { %v56_v35 = vadd.f32 %v55_v33, %v358_v32 }
  0x24   :  { %v57_v37 = vadd.f32 %v56_v35, %v364_v34 }
  0x26   :  { %v58_v39 = vadd.f32 %v57_v37, %v370_v36 }
  0x28   :  { %v59_v41 = vadd.f32 %v58_v39, %v376_v38 }
  0x2a   :  { %v60_v43 = vadd.f32 %v59_v41, %v382_v40 }
  0x2c   :  { %v61_v45 = vadd.f32 %v60_v43, %v388_v42 }
  0x2e   :  { %v62_v47 = vadd.f32 %v61_v45, %v394_v44 }
  0x30   :  { %v63_v49 = vadd.f32 %v62_v47, %v400_v46 }
  0x32   :  { %v64_v51 = vadd.f32 %v63_v49, %v406_v48 }
  0x34   :  { %v65_v53 = vadd.f32 %v64_v51, %v412_v50 }
  0x36   :  { %v66_v55 = vadd.f32 %v65_v53, %v418_v52 }
  0x38   :  { %v67_v57 = vadd.f32 %v66_v55, %v424_v54 }
  0x3a   :  { %v68_v59 = vadd.f32 %v67_v57, %v430_v56 }
  0x3c   :  { %v69_v61 = vadd.f32 %v68_v59, %v436_v58 }
  0x3e   :  { %v70_v62 = vadd.f32 %v69_v61, %v442_v60 }
  0x40   :  { %71 = vadd.xlane.f32.xlu0 %v70_v62 }
  0xcd   :  { %v72_v63 = vpop.xlane.xlu0 %71 }
  0xce   :  { %v446_v3 = vmul.f32 0.00024414063, %v72_v63 }
  0xd0   :  { %v450_v5 = vsub.f32 %v257_v0, %v446_v3  ;;  %v454_v7 = vsub.f32 %v262_v1, %v446_v3  ;;  %v458_v9 = vsub.f32 %v267_v2, %v446_v3  ;;  %v466_v15 = vsub.f32 %v274_v4, %v446_v3 }
  0xd1   :  { %v470_v0 = vsub.f32 %v280_v6, %v446_v3  ;;  %v476_v2 = vsub.f32 %v286_v8, %v446_v3  ;;  %v482_v4 = vsub.f32 %v292_v10, %v446_v3  ;;  %v488_v25 = vsub.f32 %v298_v12, %v446_v3 }
  0xd2   :  { %v106_v11 = vmul.f32 %v450_v5, %v450_v5  ;;  %v107_v13 = vmul.f32 %v454_v7, %v454_v7  ;;  %v108_v1 = vmul.f32 %v458_v9, %v458_v9  ;;  %v109_v19 = vmul.f32 %v466_v15, %v466_v15 }
  0xd3   :  { %v110_v6 = vmul.f32 %v470_v0, %v470_v0  ;;  %v111_v8 = vmul.f32 %v476_v2, %v476_v2  ;;  %v494_v29 = vsub.f32 %v304_v14, %v446_v3  ;;  %v112_v10 = vmul.f32 %v482_v4, %v482_v4 }
  0xd4   :  { %v138_v17 = vadd.f32 %v107_v13, %v106_v11  ;;  %v500_v33 = vsub.f32 %v310_v16, %v446_v3  ;;  %v113_v12 = vmul.f32 %v488_v25, %v488_v25  ;;  %v506_v37 = vsub.f32 %v316_v18, %v446_v3 }
  0xd5   :  { %v114_v14 = vmul.f32 %v494_v29, %v494_v29  ;;  %v512_v41 = vsub.f32 %v322_v20, %v446_v3  ;;  %v518_v45 = vsub.f32 %v328_v22, %v446_v3  ;;  %v524_v49 = vsub.f32 %v334_v24, %v446_v3 }
  0xd6   :  { %v139_v21 = vadd.f32 %v138_v17, %v108_v1  ;;  %v115_v16 = vmul.f32 %v500_v33, %v500_v33  ;;  %v116_v18 = vmul.f32 %v506_v37, %v506_v37  ;;  %v530_v53 = vsub.f32 %v340_v26, %v446_v3 }
  0xd7   :  { %v117_v20 = vmul.f32 %v512_v41, %v512_v41  ;;  %v118_v22 = vmul.f32 %v518_v45, %v518_v45  ;;  %v536_v57 = vsub.f32 %v346_v28, %v446_v3  ;;  %v119_v24 = vmul.f32 %v524_v49, %v524_v49 }
  0xd8   :  { %v140_v23 = vadd.f32 %v139_v21, %v109_v19  ;;  %v542_v61 = vsub.f32 %v352_v30, %v446_v3  ;;  %v120_v26 = vmul.f32 %v530_v53, %v530_v53  ;;  %v548_v63 = vsub.f32 %v358_v32, %v446_v3 }
  0xd9   :  { %v121_v28 = vmul.f32 %v536_v57, %v536_v57  ;;  %v554_v13 = vsub.f32 %v364_v34, %v446_v3  ;;  %v560_v17 = vsub.f32 %v370_v36, %v446_v3  ;;  %v566_v21 = vsub.f32 %v376_v38, %v446_v3 }
  0xda   :  { %v141_v27 = vadd.f32 %v140_v23, %v110_v6  ;;  %v122_v30 = vmul.f32 %v542_v61, %v542_v61  ;;  %v123_v32 = vmul.f32 %v548_v63, %v548_v63  ;;  %v572_v23 = vsub.f32 %v382_v40, %v446_v3 }
  0xdb   :  { %v124_v34 = vmul.f32 %v554_v13, %v554_v13  ;;  %v125_v36 = vmul.f32 %v560_v17, %v560_v17  ;;  %v126_v38 = vmul.f32 %v566_v21, %v566_v21 }
  0xdc   :  { %v142_v31 = vadd.f32 %v141_v27, %v111_v8  ;;  %v578_v27 = vsub.f32 %v388_v42, %v446_v3  ;;  %v127_v40 = vmul.f32 %v572_v23, %v572_v23 }
  0xde   :  { %v143_v35 = vadd.f32 %v142_v31, %v112_v10  ;;  %v584_v31 = vsub.f32 %v394_v44, %v446_v3  ;;  %v128_v42 = vmul.f32 %v578_v27, %v578_v27 }
  0xe0   :  { %v144_v39 = vadd.f32 %v143_v35, %v113_v12  ;;  %v590_v35 = vsub.f32 %v400_v46, %v446_v3  ;;  %v129_v44 = vmul.f32 %v584_v31, %v584_v31 }
  0xe2   :  { %v145_v43 = vadd.f32 %v144_v39, %v114_v14  ;;  %v596_v39 = vsub.f32 %v406_v48, %v446_v3  ;;  %v130_v46 = vmul.f32 %v590_v35, %v590_v35 }
  0xe4   :  { %v146_v47 = vadd.f32 %v145_v43, %v115_v16  ;;  %v602_v43 = vsub.f32 %v412_v50, %v446_v3  ;;  %v131_v48 = vmul.f32 %v596_v39, %v596_v39 }
  0xe6   :  { %v147_v51 = vadd.f32 %v146_v47, %v116_v18  ;;  %v608_v47 = vsub.f32 %v418_v52, %v446_v3  ;;  %v132_v50 = vmul.f32 %v602_v43, %v602_v43 }
  0xe8   :  { %v148_v55 = vadd.f32 %v147_v51, %v117_v20  ;;  %v614_v51 = vsub.f32 %v424_v54, %v446_v3  ;;  %v133_v52 = vmul.f32 %v608_v47, %v608_v47 }
  0xea   :  { %v149_v59 = vadd.f32 %v148_v55, %v118_v22  ;;  %v620_v55 = vsub.f32 %v430_v56, %v446_v3  ;;  %v134_v54 = vmul.f32 %v614_v51, %v614_v51 }
  0xec   :  { %v150_v62 = vadd.f32 %v149_v59, %v119_v24  ;;  %v626_v59 = vsub.f32 %v436_v58, %v446_v3  ;;  %v135_v56 = vmul.f32 %v620_v55, %v620_v55 }
  0xee   :  { %v151_v11 = vadd.f32 %v150_v62, %v120_v26  ;;  %v632_v62 = vsub.f32 %v442_v60, %v446_v3 }
  0xf0   :  { %v152_v1 = vadd.f32 %v151_v11, %v121_v28  ;;  %v136_v11 = vmul.f32 %v626_v59, %v626_v59  ;;  %v137_v58 = vmul.f32 %v632_v62, %v632_v62 }
  0xf2   :  { %v153_v19 = vadd.f32 %v152_v1, %v122_v30 }
  0xf4   :  { %v154_v6 = vadd.f32 %v153_v19, %v123_v32 }
  0xf6   :  { %v155_v8 = vadd.f32 %v154_v6, %v124_v34 }
  0xf8   :  { %v156_v10 = vadd.f32 %v155_v8, %v125_v36 }
  0xfa   :  { %v157_v12 = vadd.f32 %v156_v10, %v126_v38 }
  0xfc   :  { %v158_v14 = vadd.f32 %v157_v12, %v127_v40 }
  0xfe   :  { %v159_v16 = vadd.f32 %v158_v14, %v128_v42 }
 0x100   :  { %v160_v18 = vadd.f32 %v159_v16, %v129_v44 }
 0x102   :  { %v161_v20 = vadd.f32 %v160_v18, %v130_v46 }
 0x104   :  { %v162_v22 = vadd.f32 %v161_v20, %v131_v48 }
 0x106   :  { %v163_v24 = vadd.f32 %v162_v22, %v132_v50 }
 0x108   :  { %v164_v26 = vadd.f32 %v163_v24, %v133_v52 }
 0x10a   :  { %v165_v28 = vadd.f32 %v164_v26, %v134_v54 }
 0x10c   :  { %v166_v30 = vadd.f32 %v165_v28, %v135_v56 }
 0x10e   :  { %v167_v1 = vadd.f32 %v166_v30, %v136_v11 }
 0x110   :  { %v168_v32 = vadd.f32 %v167_v1, %v137_v58 }
 0x112   :  { %169 = vadd.xlane.f32.xlu0 %v168_v32 }
 0x19f   :  { %v170_v19 = vpop.xlane.xlu0 %169 }
 0x1a0   :  { %v171_v34 = vmul.f32 0.00024414063, %v170_v19 }
 0x1a2   :  { %v172_v6 = vadd.f32 1e-05, %v171_v34 }
 0x1a4   :  { %242 = vrsqrt.f32 %v172_v6 }
 0x1ae   :  { %v243_v60 = vpop.eup %242 }
 0x1af   :  { %v174_v3 = vmul.f32 %v243_v60, %v450_v5  ;;  %v175_v36 = vmul.f32 %v243_v60, %v454_v7  ;;  %v176_v8 = vmul.f32 %v243_v60, %v458_v9  ;;  %v177_v38 = vmul.f32 %v243_v60, %v466_v15 }
 0x1b0   :  { %v178_v10 = vmul.f32 %v243_v60, %v470_v0  ;;  %v179_v40 = vmul.f32 %v243_v60, %v476_v2  ;;  %v180_v12 = vmul.f32 %v243_v60, %v482_v4  ;;  %v181_v42 = vmul.f32 %v243_v60, %v488_v25 }
 0x1b1   :  { %v182_v14 = vmul.f32 %v243_v60, %v494_v29  ;;  %v183_v44 = vmul.f32 %v243_v60, %v500_v33  ;;  %v184_v5 = vmul.f32 %v243_v60, %v506_v37  ;;  %v185_v7 = vmul.f32 %v243_v60, %v512_v41  ;;  %206 = vst [vmem:[%s769_s1] sm:$0xff] %v174_v3 }
 0x1b2   :  { %207 = vst [vmem:[%s769_s1 + $0x8] sm:$0xff] %v175_v36  ;;  %208 = vst [vmem:[%s769_s1 + $0x10] sm:$0xff] %v176_v8  ;;  %v186_v9 = vmul.f32 %v243_v60, %v518_v45  ;;  %v187_v15 = vmul.f32 %v243_v60, %v524_v49  ;;  %v188_v0 = vmul.f32 %v243_v60, %v530_v53 }
 0x1b3   :  { %209 = vst [vmem:[%s769_s1 + $0x18] sm:$0xff] %v177_v38  ;;  %v189_v2 = vmul.f32 %v243_v60, %v536_v57  ;;  %210 = vst [vmem:[%s769_s1 + $0x20] sm:$0xff] %v178_v10  ;;  %v190_v4 = vmul.f32 %v243_v60, %v542_v61  ;;  %v191_v25 = vmul.f32 %v243_v60, %v548_v63 }
 0x1b4   :  { %211 = vst [vmem:[%s769_s1 + $0x28] sm:$0xff] %v179_v40  ;;  %212 = vst [vmem:[%s769_s1 + $0x30] sm:$0xff] %v180_v12  ;;  %v192_v29 = vmul.f32 %v243_v60, %v554_v13  ;;  %v193_v33 = vmul.f32 %v243_v60, %v560_v17  ;;  %v194_v37 = vmul.f32 %v243_v60, %v566_v21 }
 0x1b5   :  { %213 = vst [vmem:[%s769_s1 + $0x38] sm:$0xff] %v181_v42  ;;  %214 = vst [vmem:[%s769_s1 + $0x40] sm:$0xff] %v182_v14  ;;  %v195_v41 = vmul.f32 %v243_v60, %v572_v23  ;;  %v196_v45 = vmul.f32 %v243_v60, %v578_v27  ;;  %v197_v49 = vmul.f32 %v243_v60, %v584_v31 }
 0x1b6   :  { %215 = vst [vmem:[%s769_s1 + $0x48] sm:$0xff] %v183_v44  ;;  %216 = vst [vmem:[%s769_s1 + $0x50] sm:$0xff] %v184_v5  ;;  %v198_v53 = vmul.f32 %v243_v60, %v590_v35  ;;  %v199_v57 = vmul.f32 %v243_v60, %v596_v39  ;;  %v200_v61 = vmul.f32 %v243_v60, %v602_v43 }
 0x1b7   :  { %217 = vst [vmem:[%s769_s1 + $0x58] sm:$0xff] %v185_v7  ;;  %218 = vst [vmem:[%s769_s1 + $0x60] sm:$0xff] %v186_v9  ;;  %v201_v63 = vmul.f32 %v243_v60, %v608_v47  ;;  %v202_v13 = vmul.f32 %v243_v60, %v614_v51  ;;  %v203_v17 = vmul.f32 %v243_v60, %v620_v55 }
 0x1b8   :  { %219 = vst [vmem:[%s769_s1 + $0x68] sm:$0xff] %v187_v15  ;;  %220 = vst [vmem:[%s769_s1 + $0x70] sm:$0xff] %v188_v0  ;;  %v204_v21 = vmul.f32 %v243_v60, %v626_v59  ;;  %v205_v23 = vmul.f32 %v243_v60, %v632_v62 }
 0x1b9   :  { %221 = vst [vmem:[%s769_s1 + $0x78] sm:$0xff] %v189_v2  ;;  %222 = vst [vmem:[%s769_s1 + $0x80] sm:$0xff] %v190_v4 }
 0x1ba   :  { %223 = vst [vmem:[%s769_s1 + $0x88] sm:$0xff] %v191_v25  ;;  %224 = vst [vmem:[%s769_s1 + $0x90] sm:$0xff] %v192_v29 }
 0x1bb   :  { %225 = vst [vmem:[%s769_s1 + $0x98] sm:$0xff] %v193_v33  ;;  %226 = vst [vmem:[%s769_s1 + $0xa0] sm:$0xff] %v194_v37 }
 0x1bc   :  { %227 = vst [vmem:[%s769_s1 + $0xa8] sm:$0xff] %v195_v41  ;;  %228 = vst [vmem:[%s769_s1 + $0xb0] sm:$0xff] %v196_v45 }
 0x1bd   :  { %229 = vst [vmem:[%s769_s1 + $0xb8] sm:$0xff] %v197_v49  ;;  %230 = vst [vmem:[%s769_s1 + $0xc0] sm:$0xff] %v198_v53 }
 0x1be   :  { %231 = vst [vmem:[%s769_s1 + $0xc8] sm:$0xff] %v199_v57  ;;  %232 = vst [vmem:[%s769_s1 + $0xd0] sm:$0xff] %v200_v61 }
 0x1bf   :  { %233 = vst [vmem:[%s769_s1 + $0xd8] sm:$0xff] %v201_v63  ;;  %234 = vst [vmem:[%s769_s1 + $0xe0] sm:$0xff] %v202_v13 }
 0x1c0   :  { %235 = vst [vmem:[%s769_s1 + $0xe8] sm:$0xff] %v203_v17  ;;  %236 = vst [vmem:[%s769_s1 + $0xf0] sm:$0xff] %v204_v21 }
 0x1c1   :  { %237 = vst [vmem:[%s769_s1 + $0xf8] sm:$0xff] %v205_v23 }

</bundles_post_ra>
